<compile_context>
chip_gen: v7x
topology: tpu7x:2x2x1
jax: 0.10.0
libtpu: 0.0.40
codegen_flags: <defaults>
</compile_context>

<pallas_src>
import jax
import jax.numpy as jnp
from jax.experimental import pallas as pl
from jax.experimental.pallas import tpu as pltpu


def dqn_forward_kernel(x_ref, w1_ref, b1_ref, w2_ref, b2_ref,
                       w3_ref, b3_ref, w4_ref, b4_ref, o_ref):
    # x_ref: (TB, in_dim) bf16, w*: bf16 (in, out), b*: (1, out) f32,
    # o_ref: (TB, OUT_PAD) f32 (lane-dense).
    # fc1 + relu   (MXU matmul, f32 accumulation; bias+relu on VPU in f32)
    h = jnp.dot(x_ref[...], w1_ref[...], preferred_element_type=jnp.float32)
    h = jnp.maximum(h + b1_ref[...], 0.0)
    # fc2 + relu
    h = jnp.dot(h.astype(jnp.bfloat16), w2_ref[...],
                preferred_element_type=jnp.float32)
    h = jnp.maximum(h + b2_ref[...], 0.0)
    # fc3 + relu
    h = jnp.dot(h.astype(jnp.bfloat16), w3_ref[...],
                preferred_element_type=jnp.float32)
    h = jnp.maximum(h + b3_ref[...], 0.0)
    # fc4 (no activation); output slab is 128-lane padded -> unmasked stores
    h = jnp.dot(h.astype(jnp.bfloat16), w4_ref[...],
                preferred_element_type=jnp.float32)
    o_ref[...] = (h + b4_ref[...]).astype(o_ref.dtype)


def dqn_forward(x, params, *, tb=128):
    """x: (B, input_dim) f32; params: list of (W, b) with W in (in, out) layout.

    Returns (B, output_dim) f32 Q-values.
    """
    (w1, b1), (w2, b2), (w3, b3), (w4, b4) = params
    B, in_dim = x.shape
    h1, h2, h3 = w1.shape[1], w2.shape[1], w3.shape[1]
    out_dim = w4.shape[1]

    # --- lane-dense output: pad the last layer's output features to 128 ---
    lane = 128
    out_pad = max(lane, ((out_dim + lane - 1) // lane) * lane)
    w4p = jnp.zeros((w4.shape[0], out_pad), w4.dtype).at[:, :out_dim].set(w4)
    b4p = jnp.zeros((1, out_pad), b4.dtype).at[:, :out_dim].set(b4)

    # --- pad batch to a multiple of the tile ---
    num_tiles = pl.cdiv(B, tb)
    b_pad = num_tiles * tb
    xp = x if b_pad == B else jnp.zeros((b_pad, in_dim), x.dtype).at[:B].set(x)

    # bf16 inputs/weights, f32 biases (added in f32 inside the kernel)
    xp = xp.astype(jnp.bfloat16)
    to_bf16 = lambda w: w.astype(jnp.bfloat16)
    to_f32 = lambda b: b.astype(jnp.float32)

    # weights/biases: block index (0,0) for every grid step -> VMEM-resident
    def resident(shape):
        return pl.BlockSpec(shape, lambda i: (0, 0))

    out = pl.pallas_call(
        dqn_forward_kernel,
        out_shape=jax.ShapeDtypeStruct((b_pad, out_pad), jnp.float32),
        grid=(num_tiles,),
        in_specs=[
            pl.BlockSpec((tb, in_dim), lambda i: (i, 0)),   # x tile (pipelined)
            resident((in_dim, h1)), resident((1, h1)),      # fc1
            resident((h1, h2)),     resident((1, h2)),      # fc2
            resident((h2, h3)),     resident((1, h3)),      # fc3
            resident((h3, out_pad)), resident((1, out_pad)),  # fc4 (padded)
        ],
        out_specs=pl.BlockSpec((tb, out_pad), lambda i: (i, 0)),
        compiler_params=pltpu.CompilerParams(
            dimension_semantics=("parallel",)),
    )(xp,
      to_bf16(w1), to_f32(b1),
      to_bf16(w2), to_f32(b2),
      to_bf16(w3), to_f32(b3),
      to_bf16(w4p), to_f32(b4p))

    return out[:B, :out_dim]


def init_linear(key, in_features, out_features):
    """Deterministic init mirroring nn.Linear's U(-1/sqrt(fan_in), 1/sqrt(fan_in))."""
    kw, kb = jax.random.split(key)
    bound = 1.0 / jnp.sqrt(jnp.float32(in_features))
    # W stored as (in, out)  (transposed relative to torch's (out, in))
    w = jax.random.uniform(kw, (in_features, out_features), jnp.float32,
                           minval=-bound, maxval=bound)
    b = jax.random.uniform(kb, (1, out_features), jnp.float32,
                           minval=-bound, maxval=bound)
    return w, b


def dqn_forward_ref(x, params):
    """Plain-JAX reference using the same bf16-weights / f32-accumulation recipe."""
    h = x.astype(jnp.bfloat16)
    n = len(params)
    y = None
    for i, (w, b) in enumerate(params):
        y = jnp.dot(h, w.astype(jnp.bfloat16),
                    preferred_element_type=jnp.float32) + b.astype(jnp.float32)
        if i < n - 1:
            h = jnp.maximum(y, 0.0).astype(jnp.bfloat16)
    return y


if __name__ == "__main__":
    key = jax.random.PRNGKey(0)
    k_x, k1, k2, k3, k4 = jax.random.split(key, 5)

    # Shapes consistent with DQNAgent(input_dim=32, output_dim=8).
    # batch=200 is a typical (small) replay-batch size and is deliberately NOT
    # a multiple of the 128-row tile, exercising the batch-padding path.
    batch = 200
    input_dim = 32
    output_dim = 8

    x = jax.random.normal(k_x, (batch, input_dim), jnp.float32)

    params = [
        init_linear(k1, input_dim, 128),
        init_linear(k2, 128, 256),
        init_linear(k3, 256, 128),
        init_linear(k4, 128, output_dim),
    ]

    out = dqn_forward(x, params, tb=128)
    out = jax.block_until_ready(out)

    ref = dqn_forward_ref(x, params)
    assert out.shape == (batch, output_dim)
    # bf16 weights/activations -> loosened tolerance vs the old pure-f32 check
    assert jnp.allclose(out, ref, atol=1e-2, rtol=1e-2), "mismatch vs JAX reference"

    print("KERNEL_OK")
</pallas_src>

<mosaic_0001>
module attributes {stable_mosaic.version = 11 : i64} {
  func.func @dqn_forward_kernel(%arg0: i32, %arg1: memref<128x32xbf16, #tpu.memory_space<vmem>>, %arg2: memref<32x128xbf16, #tpu.memory_space<vmem>>, %arg3: memref<1x128xf32, #tpu.memory_space<vmem>>, %arg4: memref<128x256xbf16, #tpu.memory_space<vmem>>, %arg5: memref<1x256xf32, #tpu.memory_space<vmem>>, %arg6: memref<256x128xbf16, #tpu.memory_space<vmem>>, %arg7: memref<1x128xf32, #tpu.memory_space<vmem>>, %arg8: memref<128x128xbf16, #tpu.memory_space<vmem>>, %arg9: memref<1x128xf32, #tpu.memory_space<vmem>>, %arg10: memref<128x128xf32, #tpu.memory_space<vmem>>) attributes {dimension_semantics = [#tpu.dimension_semantics<parallel>], iteration_bounds = array<i64: 2>, scalar_prefetch = 0 : i64, scratch_operands = 0 : i64, tpu.core_type = #tpu.core_type<tc>, window_params = [{transform_indices = @transform_0, window_bounds = array<i64: 128, 32>}, {pipeline_mode = #tpu.pipeline_mode<synchronous>, transform_indices = @transform_1, window_bounds = array<i64: 32, 128>}, {pipeline_mode = #tpu.pipeline_mode<synchronous>, transform_indices = @transform_2, window_bounds = array<i64: 1, 128>}, {pipeline_mode = #tpu.pipeline_mode<synchronous>, transform_indices = @transform_3, window_bounds = array<i64: 128, 256>}, {pipeline_mode = #tpu.pipeline_mode<synchronous>, transform_indices = @transform_4, window_bounds = array<i64: 1, 256>}, {pipeline_mode = #tpu.pipeline_mode<synchronous>, transform_indices = @transform_5, window_bounds = array<i64: 256, 128>}, {pipeline_mode = #tpu.pipeline_mode<synchronous>, transform_indices = @transform_6, window_bounds = array<i64: 1, 128>}, {pipeline_mode = #tpu.pipeline_mode<synchronous>, transform_indices = @transform_7, window_bounds = array<i64: 128, 128>}, {pipeline_mode = #tpu.pipeline_mode<synchronous>, transform_indices = @transform_8, window_bounds = array<i64: 1, 128>}, {transform_indices = @transform_9, window_bounds = array<i64: 128, 128>}]} {
    %c0 = arith.constant 0 : index
    %c0_0 = arith.constant 0 : index
    %0 = vector.load %arg1[%c0, %c0_0] : memref<128x32xbf16, #tpu.memory_space<vmem>>, vector<128x32xbf16>
    %c0_1 = arith.constant 0 : index
    %c0_2 = arith.constant 0 : index
    %1 = vector.load %arg2[%c0_1, %c0_2] : memref<32x128xbf16, #tpu.memory_space<vmem>>, vector<32x128xbf16>
    %cst = arith.constant dense<0.000000e+00> : vector<128x128xf32>
    %2 = tpu.matmul %0, %1, %cst {dimension_numbers = #tpu.dot_dimension_numbers<[1], [0], [0], [1], [0, 0, 1, 1], [], []>} : vector<128x32xbf16>, vector<32x128xbf16>, vector<128x128xf32> -> vector<128x128xf32>
    %c0_3 = arith.constant 0 : index
    %c0_4 = arith.constant 0 : index
    %3 = vector.load %arg3[%c0_3, %c0_4] : memref<1x128xf32, #tpu.memory_space<vmem>>, vector<1x128xf32>
    %4 = vector.broadcast %3 : vector<1x128xf32> to vector<128x128xf32>
    %5 = arith.addf %2, %4 : vector<128x128xf32>
    %cst_5 = arith.constant 0.000000e+00 : f32
    %6 = vector.broadcast %cst_5 : f32 to vector<128x128xf32>
    %7 = arith.maximumf %5, %6 : vector<128x128xf32>
    %8 = arith.truncf %7 : vector<128x128xf32> to vector<128x128xbf16>
    %c0_6 = arith.constant 0 : index
    %c0_7 = arith.constant 0 : index
    %9 = vector.load %arg4[%c0_6, %c0_7] : memref<128x256xbf16, #tpu.memory_space<vmem>>, vector<128x256xbf16>
    %cst_8 = arith.constant dense<0.000000e+00> : vector<128x256xf32>
    %10 = tpu.matmul %8, %9, %cst_8 {dimension_numbers = #tpu.dot_dimension_numbers<[1], [0], [0], [1], [0, 0, 1, 1], [], []>} : vector<128x128xbf16>, vector<128x256xbf16>, vector<128x256xf32> -> vector<128x256xf32>
    %c0_9 = arith.constant 0 : index
    %c0_10 = arith.constant 0 : index
    %11 = vector.load %arg5[%c0_9, %c0_10] : memref<1x256xf32, #tpu.memory_space<vmem>>, vector<1x256xf32>
    %12 = vector.broadcast %11 : vector<1x256xf32> to vector<128x256xf32>
    %13 = arith.addf %10, %12 : vector<128x256xf32>
    %cst_11 = arith.constant 0.000000e+00 : f32
    %14 = vector.broadcast %cst_11 : f32 to vector<128x256xf32>
    %15 = arith.maximumf %13, %14 : vector<128x256xf32>
    %16 = arith.truncf %15 : vector<128x256xf32> to vector<128x256xbf16>
    %c0_12 = arith.constant 0 : index
    %c0_13 = arith.constant 0 : index
    %17 = vector.load %arg6[%c0_12, %c0_13] : memref<256x128xbf16, #tpu.memory_space<vmem>>, vector<256x128xbf16>
    %cst_14 = arith.constant dense<0.000000e+00> : vector<128x128xf32>
    %18 = tpu.matmul %16, %17, %cst_14 {dimension_numbers = #tpu.dot_dimension_numbers<[1], [0], [0], [1], [0, 0, 1, 1], [], []>} : vector<128x256xbf16>, vector<256x128xbf16>, vector<128x128xf32> -> vector<128x128xf32>
    %c0_15 = arith.constant 0 : index
    %c0_16 = arith.constant 0 : index
    %19 = vector.load %arg7[%c0_15, %c0_16] : memref<1x128xf32, #tpu.memory_space<vmem>>, vector<1x128xf32>
    %20 = vector.broadcast %19 : vector<1x128xf32> to vector<128x128xf32>
    %21 = arith.addf %18, %20 : vector<128x128xf32>
    %cst_17 = arith.constant 0.000000e+00 : f32
    %22 = vector.broadcast %cst_17 : f32 to vector<128x128xf32>
    %23 = arith.maximumf %21, %22 : vector<128x128xf32>
    %24 = arith.truncf %23 : vector<128x128xf32> to vector<128x128xbf16>
    %c0_18 = arith.constant 0 : index
    %c0_19 = arith.constant 0 : index
    %25 = vector.load %arg8[%c0_18, %c0_19] : memref<128x128xbf16, #tpu.memory_space<vmem>>, vector<128x128xbf16>
    %cst_20 = arith.constant dense<0.000000e+00> : vector<128x128xf32>
    %26 = tpu.matmul %24, %25, %cst_20 {dimension_numbers = #tpu.dot_dimension_numbers<[1], [0], [0], [1], [0, 0, 1, 1], [], []>} : vector<128x128xbf16>, vector<128x128xbf16>, vector<128x128xf32> -> vector<128x128xf32>
    %c0_21 = arith.constant 0 : index
    %c0_22 = arith.constant 0 : index
    %27 = vector.load %arg9[%c0_21, %c0_22] : memref<1x128xf32, #tpu.memory_space<vmem>>, vector<1x128xf32>
    %28 = vector.broadcast %27 : vector<1x128xf32> to vector<128x128xf32>
    %29 = arith.addf %26, %28 : vector<128x128xf32>
    %c0_23 = arith.constant 0 : index
    %c0_24 = arith.constant 0 : index
    %30 = vector.load %arg10[%c0_23, %c0_24] : memref<128x128xf32, #tpu.memory_space<vmem>>, vector<128x128xf32>
    tpu.vector_store %arg10[%c0_23, %c0_24], %29 {strides = array<i32>} : memref<128x128xf32, #tpu.memory_space<vmem>>, vector<128x128xf32>,
    return
  }
  func.func @transform_0(%arg0: i32) -> (i32, i32) {
    %c0_i32 = arith.constant 0 : i32
    %c0_i32_0 = arith.constant 0 : i32
    return %arg0, %c0_i32 : i32, i32
  }
  func.func @transform_1(%arg0: i32) -> (i32, i32) {
    %c0_i32 = arith.constant 0 : i32
    %c0_i32_0 = arith.constant 0 : i32
    %c0_i32_1 = arith.constant 0 : i32
    return %c0_i32, %c0_i32_0 : i32, i32
  }
  func.func @transform_2(%arg0: i32) -> (i32, i32) {
    %c0_i32 = arith.constant 0 : i32
    %c0_i32_0 = arith.constant 0 : i32
    %c0_i32_1 = arith.constant 0 : i32
    return %c0_i32, %c0_i32_0 : i32, i32
  }
  func.func @transform_3(%arg0: i32) -> (i32, i32) {
    %c0_i32 = arith.constant 0 : i32
    %c0_i32_0 = arith.constant 0 : i32
    %c0_i32_1 = arith.constant 0 : i32
    return %c0_i32, %c0_i32_0 : i32, i32
  }
  func.func @transform_4(%arg0: i32) -> (i32, i32) {
    %c0_i32 = arith.constant 0 : i32
    %c0_i32_0 = arith.constant 0 : i32
    %c0_i32_1 = arith.constant 0 : i32
    return %c0_i32, %c0_i32_0 : i32, i32
  }
  func.func @transform_5(%arg0: i32) -> (i32, i32) {
    %c0_i32 = arith.constant 0 : i32
    %c0_i32_0 = arith.constant 0 : i32
    %c0_i32_1 = arith.constant 0 : i32
    return %c0_i32, %c0_i32_0 : i32, i32
  }
  func.func @transform_6(%arg0: i32) -> (i32, i32) {
    %c0_i32 = arith.constant 0 : i32
    %c0_i32_0 = arith.constant 0 : i32
    %c0_i32_1 = arith.constant 0 : i32
    return %c0_i32, %c0_i32_0 : i32, i32
  }
  func.func @transform_7(%arg0: i32) -> (i32, i32) {
    %c0_i32 = arith.constant 0 : i32
    %c0_i32_0 = arith.constant 0 : i32
    %c0_i32_1 = arith.constant 0 : i32
    return %c0_i32, %c0_i32_0 : i32, i32
  }
  func.func @transform_8(%arg0: i32) -> (i32, i32) {
    %c0_i32 = arith.constant 0 : i32
    %c0_i32_0 = arith.constant 0 : i32
    %c0_i32_1 = arith.constant 0 : i32
    return %c0_i32, %c0_i32_0 : i32, i32
  }
  func.func @transform_9(%arg0: i32) -> (i32, i32) {
    %c0_i32 = arith.constant 0 : i32
    %c0_i32_0 = arith.constant 0 : i32
    return %arg0, %c0_i32 : i32, i32
  }
}

</mosaic_0001>

<bundles_post_ra>
// kernel: tpu_custom_call.1
= control target key start
LH: loop header
LB: loop body
LE: loop exit
PB: predicated region body
PF: predicated region fallthrough
CT: control target
= control target key end

     0   :  { %14 = vsyncpa [#allocation3], 0  ;;  %s2285_s0 = inlined_call_operand.vmem [shape: bf16[256,32], index: 0, kind: input, shape index: {}]   ;;  %s2286_s1 = inlined_call_operand.vmem [shape: bf16[32,128], index: 1, kind: input, shape index: {}]   ;;  %s2287_s2 = inlined_call_operand.vmem [shape: f32[1,128], index: 2, kind: input, shape index: {}]   ;;  %s2288_s3 = inlined_call_operand.vmem [shape: bf16[128,256], index: 3, kind: input, shape index: {}]   ;;  %s2289_s4 = inlined_call_operand.vmem [shape: f32[1,256], index: 4, kind: input, shape index: {}]   ;;  %s2290_s5 = inlined_call_operand.hbm [shape: bf16[256,128], index: 5, kind: input, shape index: {}]   ;;  %s2291_s6 = inlined_call_operand.vmem [shape: f32[1,128], index: 6, kind: input, shape index: {}]   ;;  %s2292_s7 = inlined_call_operand.hbm [shape: bf16[128,128], index: 7, kind: input, shape index: {}]   ;;  %s2293_s8 = inlined_call_operand.vmem [shape: f32[1,128], index: 8, kind: input, shape index: {}]   ;;  %s2294_s9 = inlined_call_operand.hbm [shape: f32[256,128], index: 9, kind: output, shape index: {}]  }
   0x1   :  { %15 = vsyncpa [#allocation6], 0 }
   0x2   :  { %16 = vsyncpa [#allocation4], 0 }
   0x3   :  { %18 = vsyncpa [#allocation4 + $0x1], 0  ;;  %s1942_s30 = smov 0   ;;  %s1944_s10 = smov 0  }
   0x4   :  { %s1946_s11 = smov 0   ;;  %s1948_s12 = smov 0  }
   0x5 LB: > { %2301 = sst [smem:[#allocation11_spill]] %s1878_s11  ;;  %s1963_s13 = sadd.s32 4294967295, %s1882_s12   ;;  %s1882_s12 = sphi %s1948_s12, %s2315_s12   ;;  %s1878_s11 = sphi %s1946_s11, %s2317_s11   ;;  %s1874_s10 = sphi %s1944_s10, %s2319_s10   ;;  %s1870_s30 = sphi %s1942_s30, %s2318_s30  }
   0x6   : > { %s1397_s14 = sadd.s32 4294967294, %s1882_s12   ;;  %s1967_s15 = sadd.s32 1, %s1882_s12  }
   0x7   : > { %2302 = sst [smem:[#allocation12_spill]] %s1967_s15  ;;  %s225_s16 = sadd.s32 1, %s1878_s11 }
   0x8   : > { %s222_s17 = ssub.s32 %s1882_s12, %s1967_s15  ;;  %p235_p0 = scmp.ne.s32.totalorder %s1878_s11, %s1874_s10 }
   0x9   : > { %p223_p1 = scmp.eq.s32.totalorder %s222_s17, 0  ;;  %p236_p2 = scmp.eq.s32.totalorder %s1963_s13, 1 }
   0xa   : > { %p241_p3 = scmp.ne.s32.totalorder %s1874_s10, %s1870_s30  ;;  %p242_p4 = scmp.eq.s32.totalorder %s1397_s14, 1 }
   0xb   : > { %s1978_s18 = scalar_select %p223_p1, %s1878_s11, %s225_s16  }
   0xc   : > { %p1980_p5 = por %p236_p2, %p235_p0  ;;  %p1984_p6 = por %p242_p4, %p241_p3 }
   0xd   : > { %2303 = sst [smem:[#allocation13_spill]] %s1978_s18  ;;  %p1398_p7 = scmp.ge.s32.totalorder %s1882_s12, 1 }
   0xe   : > { %s2304_s19 = scalar_select %p1980_p5, 1, 0 }
   0xf   : > { %s2305_s20 = scalar_select %p1984_p6, 1, 0 }
  0x10   : > { %p249_p8 = scmp.lt.s32.totalorder %s1882_s12, 3  ;;  %p2295_p9 = scmp.eq.s32.totalorder %s1963_s13, 0 }
  0x11   : > { %s1884_s22 = smov [#allocation2]   ;;  %s1885_s25 = smov [#allocation5]  }
  0x12   : > { %p1991_p10 = pnand %p1398_p7, %p249_p8  ;;  %s273_s23 = sshll.u32 %s1884_s22, 4  ;;  %s274_s23 = int_to_ptr.vmem [resolvable:$true] %s273_s23 }
  0x13   : > { %s289_s26 = sshll.u32 %s1885_s25, 4  ;;  %s1756_s29 = scalar_lea.hbm %s2290_s5, 2048  ;;  %s2003_s26 = int_to_ptr.vmem [resolvable:$true] %s289_s26 }
  0x14   : > { %s2306_s21 = scalar_select %p1991_p10, 1, 0 }
  0x15   : > { %p1643_p11 = pneg %p1991_p10  ;;  %p1757_p13 = scmp.ne.s32.totalorder %s2290_s5, %s1756_s29 }
  0x16   : > { %p1763_p3 = scmp.lt.u32.totalorder %s1756_s29, %s2290_s5 }
  0x17   : > { %p1999_p12 = pnand %p2295_p9, %p1643_p11 }
  0x19   : > { %p1758_p0 = pneg %p1999_p12 }
  0x1b   : > { %p1759_p1 = pnand %p1758_p0, %p1757_p13 }
  0x1d   : > { %p1760_p2 = pneg %p1759_p1 }
  0x1f   : > { %p1765_p4 = pnand %p1763_p3, %p1760_p2 }
  0x21   : > { %1768 = shalt.err (!%p1765_p4)
}
  0x22   : > { %s1769_s25 = scalar_lea.vmem %s274_s23, 2048  ;;  %p1777_p9 = scmp.lt.s32.totalorder %s274_s23, %s274_s23 }
  0x23   : > { %p1770_p7 = scmp.ne.s32.totalorder %s274_s23, %s1769_s25  ;;  %p1778_p6 = scmp.lt.s32.totalorder %s1769_s25, %s1769_s25 }
  0x25   : > { %p1772_p8 = pnand %p1770_p7, %p1758_p0  ;;  %p1779_p5 = por %p1778_p6, %p1777_p9 }
  0x27   : > { %p1773_p11 = pneg %p1772_p8 }
  0x29   : > { %p1780_p10 = pnand %p1779_p5, %p1773_p11 }
  0x2b   : > { %1783 = shalt.err (!%p1780_p10)
}
  0x2c   : > { %s1886_s27 = smov 64   ;;  %s1887_s28 = smov 4  }
  0x2d   : > { %1646 = dma.hbm_to_vmem [thread:$0]  (!%p1999_p12), %s2290_s5, 2048, %s274_s23, [#allocation3], %s1886_s27, %s1886_s27, %s1887_s28  }
  0x2e   : > { %s1784_s22 = scalar_lea.hbm %s2292_s7, 1024 }
  0x2f   : > { %p1785_p13 = scmp.ne.s32.totalorder %s2292_s7, %s1784_s22  ;;  %p1791_p9 = scmp.lt.u32.totalorder %s1784_s22, %s2292_s7 }
  0x31   : > { %p1787_p5 = pnand %p1785_p13, %p1758_p0 }
  0x33   : > { %p1788_p6 = pneg %p1787_p5 }
  0x35   : > { %p1793_p10 = pnand %p1791_p9, %p1788_p6 }
  0x37   : > { %1796 = shalt.err (!%p1793_p10)
}
  0x38   : > { %s1797_s23 = scalar_lea.vmem %s2003_s26, 1024  ;;  %p1805_p4 = scmp.lt.s32.totalorder %s2003_s26, %s2003_s26 }
  0x39   : > { %p1798_p1 = scmp.ne.s32.totalorder %s2003_s26, %s1797_s23  ;;  %p1806_p7 = scmp.lt.s32.totalorder %s1797_s23, %s1797_s23 }
  0x3b   : > { %p1800_p2 = pnand %p1798_p1, %p1758_p0  ;;  %p1807_p8 = por %p1806_p7, %p1805_p4 }
  0x3d   : > { %p1801_p3 = pneg %p1800_p2 }
  0x3f   : > { %p1808_p11 = pnand %p1807_p8, %p1801_p3 }
  0x41   : > { %1811 = shalt.err (!%p1808_p11)
}
  0x42   : > { %1649 = dma.hbm_to_vmem [thread:$0]  (!%p1999_p12), %s2292_s7, 1024, %s2003_s26, [#allocation6], %s1886_s27, %s1886_s27, %s1887_s28  }
  0x43   : > { %p2308_p13 = scmp.ne.s32.totalorder %s2306_s21, 0 }
  0x44   : > { %p2309_p5 = scmp.eq.s32.totalorder (!%p2308_p13), %s1963_s13, 0 }
  0x45   : > { %317 = sbr.rel (%p2308_p13) target bundleno = 1044 (0x414), region = 56 }
  0x4c   : > { %1857 = dma.done.wait (%p2309_p5), [#allocation3], 2048   ;;  %p2310_p0 = pmov %p2309_p5 }
  0x4e   : > { %1859 = vsyncadd (%p2310_p0), [#allocation3], 4294965248  ;;  %p2311_p6 = pmov %p2310_p0 }
  0x4f   : > { %p2312_p9 = pmov %p2310_p0 }
  0x50   : > { %1861 = dma.done.wait (%p2311_p6), [#allocation6], 1024  }
  0x51   : > { %1863 = vsyncadd (%p2312_p9), [#allocation6], 4294966272  ;;  %s1406_s18 = sshll.u32 %s1963_s13, 4  ;;  %v1698_v0 = vld [vmem:[%s2286_s1] sm:$0xff]   ;;  %v1699_v1 = vld [vmem:[%s2286_s1 + $0x8] sm:$0xff]   ;;  %vm444_vm0 = vcmask 261120  }
  0x52   : > { %p358_p10 = scmp.lt.s32.totalorder %s1406_s18, 31  ;;  %1565 = vmatprep.subr.bf16.mxu0 %v1698_v0  ;;  %v1708_v5 = vld [vmem:[%s2288_s3 + $0x4] ss:$8 sps:$4 sm:$0xff]   ;;  %v1710_v6 = vld [vmem:[%s2288_s3] ss:$8 sps:$4 sm:$0xff]   ;;  %v1888_v26 = vmov 0  }
  0x53   : > { %1566 = vmatpush3.bf16.msra.mxu0 %v1698_v0  ;;  %698 = vmatprep.subr.bf16.mxu1 %v1708_v5  ;;  %v1711_v7 = vld [vmem:[%s2288_s3 + $0x14] ss:$8 sps:$4 sm:$0xff]   ;;  %v1713_v9 = vld [vmem:[%s2288_s3 + $0x10] ss:$8 sps:$4 sm:$0xff]   ;;  %v1714_v10 = vld [vmem:[%s2288_s3 + $0x24] ss:$8 sps:$4 sm:$0xff]  }
  0x54   : > { %s2321_s18 = smov (!%p358_p10, %s1406_s18), 31  ;;  %1567 = vmatprep.subr.bf16.mxu0 %v1699_v1  ;;  %699 = vmatpush1.bf16.msra.mxu1 %v1710_v6  ;;  %v1716_v12 = vld [vmem:[%s2288_s3 + $0x20] ss:$8 sps:$4 sm:$0xff]   ;;  %v1717_v13 = vld [vmem:[%s2288_s3 + $0x34] ss:$8 sps:$4 sm:$0xff]   ;;  %s354_s21 = sand.u32 1, %s1874_s10  }
  0x55   : > { %s1407_s24 = sshll.u32 %s2321_s18, 2  ;;  %700 = vmatprep.subr.bf16.mxu1 %v1711_v7  ;;  %v1719_v14 = vld [vmem:[%s2288_s3 + $0x30] ss:$8 sps:$4 sm:$0xff]   ;;  %v1720_v16 = vld [vmem:[%s2288_s3 + $0x44] ss:$8 sps:$4 sm:$0xff]   ;;  %730 = vmatprep.mubr.bf16.mxu1 %v1888_v26  ;;  %s1405_s28 = sshll.u32 %s354_s21, 7 }
  0x56   : > { %s2066_s27 = scalar_lea.vmem %s2285_s0, %s1407_s24  ;;  %v1722_v18 = vld [vmem:[%s2288_s3 + $0x40] ss:$8 sps:$4 sm:$0xff]   ;;  %v1723_v19 = vld [vmem:[%s2288_s3 + $0x54] ss:$8 sps:$4 sm:$0xff]   ;;  %v1725_v20 = vld [vmem:[%s2288_s3 + $0x50] ss:$8 sps:$4 sm:$0xff]  }
  0x57   : > { %v1700_v2 = vld [vmem:[%s2066_s27] sm:$0xff]   ;;  %v1701_v3 = vld [vmem:[%s2066_s27 + $0x8] sm:$0xff]   ;;  %1568 = vmatpush3.bf16.msra.mxu0 %v1699_v1  ;;  %v1702_v4 = vld [vmem:[%s2066_s27 + $0x10] sm:$0xff]   ;;  %s2215_s16 = scalar_lea.vmem [#allocation7], %s1405_s28  ;;  %s1474_s17 = sshll.u32 %s1963_s13, 11 }
  0x58   : > { %1569 = vmatprep.mubr.msk.bf16.mxu0 %vm444_vm0, %v1700_v2  ;;  %v1703_v8 = vld [vmem:[%s2066_s27 + $0x18] sm:$0xff]   ;;  %v1704_v11 = vld [vmem:[%s2066_s27 + $0x20] sm:$0xff]   ;;  %701 = vmatpush1.bf16.msra.mxu1 %v1713_v9  ;;  %v1705_v15 = vld [vmem:[%s2066_s27 + $0x28] sm:$0xff]   ;;  %s1313_s22 = sshll.u32 %s2215_s16, 4  ;;  %s2235_s23 = scalar_lea.hbm %s2294_s9, %s1474_s17  ;;  %s2237_s22 = int_to_ptr.vmem [resolvable:$true] %s1313_s22 }
  0x59   : > { %702 = vmatprep.subr.bf16.mxu1 %v1714_v10  ;;  %v1706_v17 = vld [vmem:[%s2066_s27 + $0x30] sm:$0xff]   ;;  %v1707_v21 = vld [vmem:[%s2066_s27 + $0x38] sm:$0xff]   ;;  %v1726_v22 = vld [vmem:[%s2288_s3 + $0x64] ss:$8 sps:$4 sm:$0xff]   ;;  %s2244_s13 = scalar_lea.sflag [#allocation4], %s354_s21  ;;  %s1812_s11 = scalar_lea.vmem %s2237_s22, 2048 }
  0x5a   : > { %1570 = vmatmul.mubr.msk.bf16.vlgmr.msra.gmra.mrb[0].mxu0 %vm444_vm0, %v1701_v3  ;;  %v1728_v23 = vld [vmem:[%s2288_s3 + $0x60] ss:$8 sps:$4 sm:$0xff]   ;;  %v1729_v24 = vld [vmem:[%s2288_s3 + $0x74] ss:$8 sps:$4 sm:$0xff]   ;;  %v1731_v25 = vld [vmem:[%s2288_s3 + $0x70] ss:$8 sps:$4 sm:$0xff]   ;;  %p1813_p12 = scmp.ne.s32.totalorder %s2237_s22, %s1812_s11 }
  0x5b   : > { %1573 = vmatprep.mubr.msk.bf16.mxu0 %vm444_vm0, %v1702_v4  ;;  %v1732_v27 = vld [vmem:[#allocation2 + $0x40] sm:$0xff]   ;;  %v1734_v29 = vld [vmem:[#allocation2 + $0x48] sm:$0xff]   ;;  %v1736_v31 = vld [vmem:[#allocation2 + $0x50] sm:$0xff]   ;;  %p2313_p1 = scmp.ne.s32.totalorder %s2304_s19, 0  ;;  %s1889_s15 = smov [#allocation7]  }
  0x5c   : > { %703 = vmatpush1.bf16.msra.mxu1 %v1716_v12  ;;  %v1733_v28 = vld [vmem:[#allocation2] sm:$0xff]   ;;  %1485 = vmatprep.subr.bf16.mxu0 %v1732_v27  ;;  %v1735_v30 = vld [vmem:[#allocation2 + $0x8] sm:$0xff]   ;;  %v1737_v32 = vld [vmem:[#allocation2 + $0x10] sm:$0xff]   ;;  %s1816_s18 = sshll.u32 %s1889_s15, 4  ;;  %s1817_s18 = int_to_ptr.vmem [resolvable:$false] %s1816_s18 }
  0x5d   : > { %704 = vmatprep.subr.bf16.mxu1 %v1717_v13  ;;  %1486 = vmatpush3.bf16.msra.mxu0 %v1733_v28  ;;  %v1738_v33 = vld [vmem:[#allocation2 + $0x58] sm:$0xff]   ;;  %v1740_v35 = vld [vmem:[#allocation2 + $0x60] sm:$0xff]   ;;  %v1742_v37 = vld [vmem:[#allocation2 + $0x68] sm:$0xff]   ;;  %p1814_p2 = pnand %p1813_p12, %p2313_p1  ;;  %s1818_s24 = scalar_lea.vmem %s1817_s18, 4096 }
  0x5e   : > { %1487 = vmatprep.subr.bf16.mxu0 %v1734_v29  ;;  %v1739_v34 = vld [vmem:[#allocation2 + $0x18] sm:$0xff]   ;;  %v1741_v36 = vld [vmem:[#allocation2 + $0x20] sm:$0xff]   ;;  %v1743_v38 = vld [vmem:[#allocation2 + $0x28] sm:$0xff]   ;;  %p1819_p4 = scmp.lt.s32.totalorder %s2237_s22, %s1817_s18  ;;  %p1820_p7 = scmp.lt.s32.totalorder %s1818_s24, %s1812_s11 }
  0x5f   : > { %v1408_v39 = vld [vmem:[%s2287_s2] ss:$0 sm:$0xff]  ;;  %p1815_p3 = pneg %p1814_p2 }
  0x60   : > { %705 = vmatpush1.bf16.msra.mxu1 %v1719_v14  ;;  %p1821_p8 = por %p1820_p7, %p1819_p4 }
  0x61   : > { %706 = vmatprep.subr.bf16.mxu1 %v1720_v16  ;;  %1488 = vmatpush3.bf16.msra.mxu0 %v1735_v30 }
  0x62   : > { %1574 = vmatmul.mubr.msk.bf16.gmra.mrb[4].mxu0 %vm444_vm0, %v1703_v8  ;;  %1489 = vmatprep.subr.bf16.mxu0 %v1736_v31  ;;  %p1822_p11 = pnand %p1821_p8, %p1815_p3 }
  0x63   : > { %1577 = vmatprep.mubr.msk.bf16.mxu0 %vm444_vm0, %v1704_v11 }
  0x64   : > { %707 = vmatpush1.bf16.msra.mxu1 %v1722_v18 }
  0x65   : > { %708 = vmatprep.subr.bf16.mxu1 %v1723_v19  ;;  %1490 = vmatpush3.bf16.msra.mxu0 %v1737_v32 }
  0x66   : > { %1491 = vmatprep.subr.bf16.mxu0 %v1738_v33  ;;  %v1744_v33 = vld [vmem:[#allocation2 + $0x70] sm:$0xff]  }
  0x68   : > { %709 = vmatpush1.bf16.msra.mxu1 %v1725_v20 }
  0x69   : > { %710 = vmatprep.subr.bf16.mxu1 %v1726_v22  ;;  %1492 = vmatpush3.bf16.msra.mxu0 %v1739_v34  ;;  %v1745_v34 = vld [vmem:[#allocation2 + $0x30] sm:$0xff]  }
  0x6a   : > { %1578 = vmatmul.mubr.msk.bf16.gmra.mrb[8].mxu0 %vm444_vm0, %v1705_v15  ;;  %1493 = vmatprep.subr.bf16.mxu0 %v1740_v35  ;;  %v1746_v35 = vld [vmem:[#allocation2 + $0x78] sm:$0xff]  }
  0x6b   : > { %1581 = vmatprep.mubr.msk.bf16.mxu0 %vm444_vm0, %v1706_v17 }
  0x6c   : > { %711 = vmatpush1.bf16.msra.mxu1 %v1728_v23 }
  0x6d   : > { %712 = vmatprep.subr.bf16.mxu1 %v1729_v24  ;;  %1494 = vmatpush3.bf16.msra.mxu0 %v1741_v36  ;;  %v1747_v36 = vld [vmem:[#allocation2 + $0x38] sm:$0xff]  }
  0x6e   : > { %1495 = vmatprep.subr.bf16.mxu0 %v1742_v37  ;;  %v1748_v37 = vld [vmem:[#allocation5] sm:$0xff]  }
  0x70   : > { %713 = vmatpush1.bf16.msra.mxu1 %v1731_v25 }
  0x71   : > { %1496 = vmatpush3.bf16.msra.mxu0 %v1743_v38  ;;  %1617 = vmatprep.subr.bf16.mxu1 %v1748_v37  ;;  %v1749_v38 = vld [vmem:[#allocation5 + $0x8] sm:$0xff]  }
  0x72   : > { %1582 = vmatmul.mubr.msk.bf16.gmra.mrb[12].mxu0 %vm444_vm0, %v1707_v21  ;;  %1497 = vmatprep.subr.bf16.mxu0 %v1744_v33 }
  0x75   : > { %1498 = vmatpush3.bf16.msra.mxu0 %v1745_v34 }
  0x76   : > { %1499 = vmatprep.subr.bf16.mxu0 %v1746_v35 }
  0x79   : > { %1500 = vmatpush3.bf16.msra.mxu0 %v1747_v36 }
  0x7a   : > { %1585 = vmatprep.subr.bf16.mxu0 %v1748_v37 }
 0x12d   : > { %v1571_v40 = vpop.f32.mrb[0].mxu0 }
 0x12e   : > { %v512_v41 = vadd.f32 %v1571_v40, %v1408_v39  ;;  %v503_v42 = vpop.f32.mrb[1].mxu0 }
 0x12f   : > { %v504_v43 = vadd.f32 %v1408_v39, %v503_v42  ;;  %v1572_v44 = vpop.f32.mrb[2].mxu0  ;;  %v606_v42 = vld [vmem:[%s2289_s4] sm:$0x3] }
 0x130   : > { %v515_v45 = vadd.f32 %v1572_v44, %v1408_v39  ;;  %v506_v46 = vpop.f32.mrb[3].mxu0  ;;  %v568_v48 = vmax.f32 %v512_v41, 0.0 }
 0x131   : > { %v507_v47 = vadd.f32 %v1408_v39, %v506_v46  ;;  %v566_v50 = vmax.f32 %v504_v43, 0.0 }
 0x132   : > { %v569_v49 = vmax.f32 %v515_v45, 0.0 }
 0x133   : > { %v567_v51 = vmax.f32 %v507_v47, 0.0 }
 0x134   : > { %v583_v52 = vpack.c.bf16 %v569_v49, %v568_v48 }
 0x135   : > { %v582_v53 = vpack.c.bf16 %v567_v51, %v566_v50  ;;  %v1575_v54 = vpop.f32.mrb[4].mxu0 }
 0x136   : > { %v528_v55 = vadd.f32 %v1575_v54, %v1408_v39  ;;  %v519_v56 = vpop.f32.mrb[5].mxu0 }
 0x137   : > { %731 = vmatmul.mubr.bf16.vlgmr.msra.gmra.mrb[0].mxu1 %v582_v53  ;;  %v520_v57 = vadd.f32 %v1408_v39, %v519_v56  ;;  %v1576_v58 = vpop.f32.mrb[6].mxu0 }
 0x138   : > { %v572_v59 = vmax.f32 %v528_v55, 0.0  ;;  %v531_v60 = vadd.f32 %v1576_v58, %v1408_v39  ;;  %v522_v61 = vpop.f32.mrb[7].mxu0  ;;  %740 = vmatprep.mubr.bf16.mxu1 %v1888_v26  ;;  %1625 = vmatpush3.bf16.msra.mxu1 %v1748_v37 }
 0x139   : > { %v570_v62 = vmax.f32 %v520_v57, 0.0  ;;  %v523_v63 = vadd.f32 %v1408_v39, %v522_v61  ;;  %1618 = vmatprep.subr.bf16.mxu1 %v1749_v38 }
 0x13a   : > { %v573_v0 = vmax.f32 %v531_v60, 0.0 }
 0x13b   : > { %v571_v1 = vmax.f32 %v523_v63, 0.0 }
 0x13c   : > { %v585_v2 = vpack.c.bf16 %v573_v0, %v572_v59  ;;  %1626 = vmatpush3.bf16.msra.mxu1 %v1749_v38 }
 0x13d   : > { %v584_v3 = vpack.c.bf16 %v571_v1, %v570_v62  ;;  %v1579_v4 = vpop.f32.mrb[8].mxu0 }
 0x13e   : > { %v544_v5 = vadd.f32 %v1579_v4, %v1408_v39  ;;  %v535_v6 = vpop.f32.mrb[9].mxu0 }
 0x13f   : > { %741 = vmatmul.mubr.bf16.gmra.mrb[4].mxu1 %v583_v52  ;;  %v536_v7 = vadd.f32 %v1408_v39, %v535_v6  ;;  %v1580_v8 = vpop.f32.mrb[10].mxu0 }
 0x140   : > { %750 = vmatprep.mubr.bf16.mxu1 %v1888_v26  ;;  %v576_v9 = vmax.f32 %v544_v5, 0.0  ;;  %v547_v10 = vadd.f32 %v1580_v8, %v1408_v39  ;;  %v538_v11 = vpop.f32.mrb[11].mxu0 }
 0x141   : > { %v574_v12 = vmax.f32 %v536_v7, 0.0  ;;  %v539_v13 = vadd.f32 %v1408_v39, %v538_v11 }
 0x142   : > { %v577_v14 = vmax.f32 %v547_v10, 0.0 }
 0x143   : > { %v575_v15 = vmax.f32 %v539_v13, 0.0 }
 0x144   : > { %v587_v16 = vpack.c.bf16 %v577_v14, %v576_v9 }
 0x145   : > { %v586_v17 = vpack.c.bf16 %v575_v15, %v574_v12  ;;  %v1583_v18 = vpop.f32.mrb[12].mxu0 }
 0x146   : > { %v560_v19 = vadd.f32 %v1583_v18, %v1408_v39  ;;  %v551_v20 = vpop.f32.mrb[13].mxu0 }
 0x147   : > { %751 = vmatmul.mubr.bf16.gmra.mrb[8].mxu1 %v584_v3  ;;  %v552_v21 = vadd.f32 %v1408_v39, %v551_v20  ;;  %v1584_v22 = vpop.f32.mrb[14].mxu0 }
 0x148   : > { %760 = vmatprep.mubr.bf16.mxu1 %v1888_v26  ;;  %v580_v23 = vmax.f32 %v560_v19, 0.0  ;;  %v563_v24 = vadd.f32 %v1584_v22, %v1408_v39  ;;  %v554_v25 = vpop.f32.mrb[15].mxu0 }
 0x149   : > { %v578_v27 = vmax.f32 %v552_v21, 0.0  ;;  %v555_v28 = vadd.f32 %v1408_v39, %v554_v25  ;;  %v1750_v39 = vld [vmem:[#allocation5 + $0x10] sm:$0xff]  }
 0x14a   : > { %v581_v29 = vmax.f32 %v563_v24, 0.0  ;;  %1619 = vmatprep.subr.bf16.mxu1 %v1750_v39 }
 0x14b   : > { %v579_v30 = vmax.f32 %v555_v28, 0.0  ;;  %1627 = vmatpush3.bf16.msra.mxu1 %v1750_v39 }
 0x14c   : > { %v589_v31 = vpack.c.bf16 %v581_v29, %v580_v23 }
 0x14d   : > { %v588_v32 = vpack.c.bf16 %v579_v30, %v578_v27 }
 0x14f   : > { %761 = vmatmul.mubr.bf16.gmra.mrb[12].mxu1 %v585_v2 }
 0x150   : > { %770 = vmatprep.mubr.bf16.mxu1 %v1888_v26 }
 0x157   : > { %771 = vmatmul.mubr.bf16.gmra.mrb[16].mxu1 %v586_v17 }
 0x158   : > { %780 = vmatprep.mubr.bf16.mxu1 %v1888_v26 }
 0x15f   : > { %781 = vmatmul.mubr.bf16.gmra.mrb[20].mxu1 %v587_v16 }
 0x160   : > { %790 = vmatprep.mubr.bf16.mxu1 %v1888_v26 }
 0x167   : > { %791 = vmatmul.mubr.bf16.gmra.mrb[24].mxu1 %v588_v32 }
 0x168   : > { %800 = vmatprep.mubr.bf16.mxu1 %v1888_v26  ;;  %v608_v26 = vlaneseq }
 0x16a   : > { %v609_v40 = vshrl.u32 %v608_v26, 7 }
 0x16c   : > { %v610_v41 = vsub.s32 0, %v609_v40  ;;  %v614_v43 = vsub.s32 1, %v609_v40 }
 0x16e   : > { %v2152_v44 = vrot.slane %v606_v42, %v610_v41  ;;  %v2154_v45 = vrot.slane %v606_v42, %v614_v43 }
 0x16f   : > { %801 = vmatmul.mubr.bf16.gmra.mrb[28].mxu1 %v589_v31 }
 0x20a   : > { %v732_v46 = vpop.f32.mrb[0].mxu1 }
 0x20b   : > { %v733_v47 = vadd.f32 %v732_v46, %v2152_v44  ;;  %v734_v48 = vpop.f32.mrb[1].mxu1 }
 0x20c   : > { %v735_v49 = vadd.f32 %v734_v48, %v2154_v45  ;;  %v736_v50 = vpop.f32.mrb[2].mxu1 }
 0x20d   : > { %v737_v51 = vadd.f32 %v736_v50, %v2152_v44  ;;  %v738_v52 = vpop.f32.mrb[3].mxu1  ;;  %v811_v54 = vmax.f32 %v733_v47, 0.0 }
 0x20e   : > { %v739_v53 = vadd.f32 %v738_v52, %v2154_v45  ;;  %v812_v56 = vmax.f32 %v735_v49, 0.0 }
 0x20f   : > { %v813_v55 = vmax.f32 %v737_v51, 0.0 }
 0x210   : > { %v814_v57 = vmax.f32 %v739_v53, 0.0 }
 0x211   : > { %v843_v58 = vpack.c.bf16 %v813_v55, %v811_v54 }
 0x212   : > { %v844_v59 = vpack.c.bf16 %v814_v57, %v812_v56  ;;  %v742_v60 = vpop.f32.mrb[4].mxu1 }
 0x213   : > { %v743_v61 = vadd.f32 %v742_v60, %v2152_v44  ;;  %v744_v62 = vpop.f32.mrb[5].mxu1 }
 0x214   : > { %v745_v63 = vadd.f32 %v744_v62, %v2154_v45  ;;  %v746_v0 = vpop.f32.mrb[6].mxu1  ;;  %1026 = vmatprep.mubr.bf16.mxu0 %v844_v59 }
 0x215   : > { %v747_v1 = vadd.f32 %v746_v0, %v2152_v44  ;;  %v748_v2 = vpop.f32.mrb[7].mxu1  ;;  %1027 = vmatmul.mubr.bf16.vlgmr.msra.gmra.mrb[16].mxu0 %v843_v58  ;;  %v815_v4 = vmax.f32 %v743_v61, 0.0 }
 0x216   : > { %v749_v3 = vadd.f32 %v748_v2, %v2154_v45  ;;  %1586 = vmatpush3.bf16.msra.mxu0 %v1748_v37  ;;  %v816_v6 = vmax.f32 %v745_v63, 0.0 }
 0x217   : > { %v817_v5 = vmax.f32 %v747_v1, 0.0  ;;  %1587 = vmatprep.subr.bf16.mxu0 %v1749_v38 }
 0x218   : > { %v818_v7 = vmax.f32 %v749_v3, 0.0 }
 0x219   : > { %v845_v8 = vpack.c.bf16 %v817_v5, %v815_v4 }
 0x21a   : > { %v846_v9 = vpack.c.bf16 %v818_v7, %v816_v6  ;;  %v752_v10 = vpop.f32.mrb[8].mxu1  ;;  %1588 = vmatpush3.bf16.msra.mxu0 %v1749_v38 }
 0x21b   : > { %v753_v11 = vadd.f32 %v752_v10, %v2152_v44  ;;  %v754_v12 = vpop.f32.mrb[9].mxu1  ;;  %1589 = vmatprep.subr.bf16.mxu0 %v1750_v39 }
 0x21c   : > { %v755_v13 = vadd.f32 %v754_v12, %v2154_v45  ;;  %v756_v14 = vpop.f32.mrb[10].mxu1  ;;  %1034 = vmatprep.mubr.bf16.mxu0 %v846_v9 }
 0x21d   : > { %v757_v15 = vadd.f32 %v756_v14, %v2152_v44  ;;  %v758_v16 = vpop.f32.mrb[11].mxu1  ;;  %1035 = vmatmul.mubr.bf16.gmra.mrb[20].mxu0 %v845_v8  ;;  %v819_v18 = vmax.f32 %v753_v11, 0.0 }
 0x21e   : > { %v759_v17 = vadd.f32 %v758_v16, %v2154_v45  ;;  %1590 = vmatpush3.bf16.msra.mxu0 %v1750_v39  ;;  %v820_v20 = vmax.f32 %v755_v13, 0.0 }
 0x21f   : > { %v821_v19 = vmax.f32 %v757_v15, 0.0 }
 0x220   : > { %v822_v21 = vmax.f32 %v759_v17, 0.0 }
 0x221   : > { %v847_v22 = vpack.c.bf16 %v821_v19, %v819_v18 }
 0x222   : > { %v848_v23 = vpack.c.bf16 %v822_v21, %v820_v20  ;;  %v762_v24 = vpop.f32.mrb[12].mxu1 }
 0x223   : > { %v763_v25 = vadd.f32 %v762_v24, %v2152_v44  ;;  %v764_v27 = vpop.f32.mrb[13].mxu1 }
 0x224   : > { %v765_v28 = vadd.f32 %v764_v27, %v2154_v45  ;;  %v766_v29 = vpop.f32.mrb[14].mxu1  ;;  %1042 = vmatprep.mubr.bf16.mxu0 %v848_v23 }
 0x225   : > { %v767_v30 = vadd.f32 %v766_v29, %v2152_v44  ;;  %v768_v31 = vpop.f32.mrb[15].mxu1  ;;  %1043 = vmatmul.mubr.bf16.gmra.mrb[24].mxu0 %v847_v22  ;;  %v823_v33 = vmax.f32 %v763_v25, 0.0 }
 0x226   : > { %v769_v32 = vadd.f32 %v768_v31, %v2154_v45  ;;  %v824_v35 = vmax.f32 %v765_v28, 0.0 }
 0x227   : > { %v825_v34 = vmax.f32 %v767_v30, 0.0 }
 0x228   : > { %v826_v36 = vmax.f32 %v769_v32, 0.0 }
 0x229   : > { %v849_v37 = vpack.c.bf16 %v825_v34, %v823_v33  ;;  %v1751_v33 = vld [vmem:[#allocation5 + $0x18] sm:$0xff]   ;;  %v1752_v34 = vld [vmem:[#allocation5 + $0x20] sm:$0xff]  }
 0x22a   : > { %v850_v38 = vpack.c.bf16 %v826_v36, %v824_v35  ;;  %v772_v39 = vpop.f32.mrb[16].mxu1  ;;  %1591 = vmatprep.subr.bf16.mxu0 %v1751_v33  ;;  %1620 = vmatprep.subr.bf16.mxu1 %v1751_v33  ;;  %v1755_v35 = vld [vmem:[#allocation5 + $0x38] sm:$0xff]  }
 0x22b   : > { %v773_v26 = vadd.f32 %v772_v39, %v2152_v44  ;;  %v774_v40 = vpop.f32.mrb[17].mxu1  ;;  %1592 = vmatpush3.bf16.msra.mxu0 %v1751_v33  ;;  %1628 = vmatpush3.bf16.msra.mxu1 %v1751_v33 }
 0x22c   : > { %v775_v41 = vadd.f32 %v774_v40, %v2154_v45  ;;  %v776_v42 = vpop.f32.mrb[18].mxu1  ;;  %1050 = vmatprep.mubr.bf16.mxu0 %v850_v38  ;;  %1593 = vmatprep.subr.bf16.mxu0 %v1752_v34 }
 0x22d   : > { %v777_v43 = vadd.f32 %v776_v42, %v2152_v44  ;;  %v778_v46 = vpop.f32.mrb[19].mxu1  ;;  %1051 = vmatmul.mubr.bf16.gmra.mrb[28].mxu0 %v849_v37  ;;  %v827_v48 = vmax.f32 %v773_v26, 0.0  ;;  %1621 = vmatprep.subr.bf16.mxu1 %v1752_v34  ;;  %v2191_v37 = vld [vmem:[%s2291_s6] ss:$0 sm:$0xff] }
 0x22e   : > { %v779_v47 = vadd.f32 %v778_v46, %v2154_v45  ;;  %v828_v50 = vmax.f32 %v775_v41, 0.0 }
 0x22f   : > { %v829_v49 = vmax.f32 %v777_v43, 0.0  ;;  %1594 = vmatpush3.bf16.msra.mxu0 %v1752_v34  ;;  %1629 = vmatpush3.bf16.msra.mxu1 %v1752_v34 }
 0x230   : > { %v830_v51 = vmax.f32 %v779_v47, 0.0 }
 0x231   : > { %v851_v52 = vpack.c.bf16 %v829_v49, %v827_v48 }
 0x232   : > { %v852_v53 = vpack.c.bf16 %v830_v51, %v828_v50  ;;  %v782_v54 = vpop.f32.mrb[20].mxu1 }
 0x233   : > { %v783_v55 = vadd.f32 %v782_v54, %v2152_v44  ;;  %v784_v56 = vpop.f32.mrb[21].mxu1 }
 0x234   : > { %v785_v57 = vadd.f32 %v784_v56, %v2154_v45  ;;  %v786_v58 = vpop.f32.mrb[22].mxu1  ;;  %1058 = vmatprep.mubr.bf16.mxu0 %v852_v53 }
 0x235   : > { %v787_v59 = vadd.f32 %v786_v58, %v2152_v44  ;;  %v788_v60 = vpop.f32.mrb[23].mxu1  ;;  %1059 = vmatmul.mubr.bf16.gmra.mrb[32].mxu0 %v851_v52  ;;  %v831_v62 = vmax.f32 %v783_v55, 0.0 }
 0x236   : > { %v789_v61 = vadd.f32 %v788_v60, %v2154_v45  ;;  %v832_v0 = vmax.f32 %v785_v57, 0.0 }
 0x237   : > { %v833_v63 = vmax.f32 %v787_v59, 0.0 }
 0x238   : > { %v834_v1 = vmax.f32 %v789_v61, 0.0 }
 0x239   : > { %v853_v2 = vpack.c.bf16 %v833_v63, %v831_v62 }
 0x23a   : > { %v854_v3 = vpack.c.bf16 %v834_v1, %v832_v0  ;;  %v792_v4 = vpop.f32.mrb[24].mxu1 }
 0x23b   : > { %v793_v5 = vadd.f32 %v792_v4, %v2152_v44  ;;  %v794_v6 = vpop.f32.mrb[25].mxu1 }
 0x23c   : > { %v795_v7 = vadd.f32 %v794_v6, %v2154_v45  ;;  %v796_v8 = vpop.f32.mrb[26].mxu1  ;;  %1066 = vmatprep.mubr.bf16.mxu0 %v854_v3 }
 0x23d   : > { %v797_v9 = vadd.f32 %v796_v8, %v2152_v44  ;;  %v798_v10 = vpop.f32.mrb[27].mxu1  ;;  %1067 = vmatmul.mubr.bf16.gmra.mrb[36].mxu0 %v853_v2  ;;  %v835_v12 = vmax.f32 %v793_v5, 0.0 }
 0x23e   : > { %v799_v11 = vadd.f32 %v798_v10, %v2154_v45  ;;  %v836_v14 = vmax.f32 %v795_v7, 0.0 }
 0x23f   : > { %v837_v13 = vmax.f32 %v797_v9, 0.0 }
 0x240   : > { %v838_v15 = vmax.f32 %v799_v11, 0.0 }
 0x241   : > { %v855_v16 = vpack.c.bf16 %v837_v13, %v835_v12 }
 0x242   : > { %v856_v17 = vpack.c.bf16 %v838_v15, %v836_v14  ;;  %v802_v18 = vpop.f32.mrb[28].mxu1 }
 0x243   : > { %v803_v19 = vadd.f32 %v802_v18, %v2152_v44  ;;  %v804_v20 = vpop.f32.mrb[29].mxu1 }
 0x244   : > { %v805_v21 = vadd.f32 %v804_v20, %v2154_v45  ;;  %v806_v22 = vpop.f32.mrb[30].mxu1  ;;  %1074 = vmatprep.mubr.bf16.mxu0 %v856_v17 }
 0x245   : > { %v807_v23 = vadd.f32 %v806_v22, %v2152_v44  ;;  %v808_v24 = vpop.f32.mrb[31].mxu1  ;;  %1075 = vmatmul.mubr.bf16.gmra.mrb[40].mxu0 %v855_v16  ;;  %v839_v27 = vmax.f32 %v803_v19, 0.0  ;;  %v1753_v44 = vld [vmem:[#allocation5 + $0x28] sm:$0xff]  }
 0x246   : > { %v809_v25 = vadd.f32 %v808_v24, %v2154_v45  ;;  %v840_v29 = vmax.f32 %v805_v21, 0.0  ;;  %1595 = vmatprep.subr.bf16.mxu0 %v1753_v44  ;;  %1622 = vmatprep.subr.bf16.mxu1 %v1753_v44  ;;  %v1754_v45 = vld [vmem:[#allocation5 + $0x30] sm:$0xff]  }
 0x247   : > { %v841_v28 = vmax.f32 %v807_v23, 0.0  ;;  %1596 = vmatpush3.bf16.msra.mxu0 %v1753_v44  ;;  %1630 = vmatpush3.bf16.msra.mxu1 %v1753_v44 }
 0x248   : > { %v842_v30 = vmax.f32 %v809_v25, 0.0  ;;  %1597 = vmatprep.subr.bf16.mxu0 %v1754_v45  ;;  %1623 = vmatprep.subr.bf16.mxu1 %v1754_v45 }
 0x249   : > { %v857_v31 = vpack.c.bf16 %v841_v28, %v839_v27 }
 0x24a   : > { %v858_v32 = vpack.c.bf16 %v842_v30, %v840_v29 }
 0x24b   : > { %1598 = vmatpush3.bf16.msra.mxu0 %v1754_v45  ;;  %1631 = vmatpush3.bf16.msra.mxu1 %v1754_v45 }
 0x24c   : > { %1082 = vmatprep.mubr.bf16.mxu0 %v858_v32  ;;  %1599 = vmatprep.subr.bf16.mxu0 %v1755_v35 }
 0x24d   : > { %1083 = vmatmul.mubr.bf16.gmra.mrb[44].mxu0 %v857_v31  ;;  %1624 = vmatprep.subr.bf16.mxu1 %v1755_v35 }
 0x24f   : > { %1600 = vmatpush3.bf16.msra.mxu0 %v1755_v35  ;;  %1632 = vmatpush3.bf16.msra.mxu1 %v1755_v35 }
 0x2e8   : > { %v1501_v36 = vpop.f32.mrb[16].mxu0 }
 0x2e9   : > { %v1502_v38 = vpop.f32.mrb[17].mxu0 }
 0x2ea   : > { %v1503_v39 = vadd.f32 %v1502_v38, %v1501_v36  ;;  %v1504_v26 = vpop.f32.mrb[18].mxu0 }
 0x2eb   : > { %v1505_v40 = vpop.f32.mrb[19].mxu0 }
 0x2ec   : > { %v1029_v41 = vadd.f32 %v1503_v39, %v2191_v37  ;;  %v1506_v42 = vadd.f32 %v1505_v40, %v1504_v26 }
 0x2ee   : > { %v1032_v43 = vadd.f32 %v1506_v42, %v2191_v37  ;;  %v1091_v46 = vmax.f32 %v1029_v41, 0.0 }
 0x2f0   : > { %v1092_v47 = vmax.f32 %v1032_v43, 0.0  ;;  %v1507_v48 = vpop.f32.mrb[20].mxu0 }
 0x2f1   : > { %v1508_v49 = vpop.f32.mrb[21].mxu0 }
 0x2f2   : > { %v1509_v50 = vadd.f32 %v1508_v49, %v1507_v48  ;;  %v1510_v51 = vpop.f32.mrb[22].mxu0  ;;  %v1107_v52 = vpack.c.bf16 %v1092_v47, %v1091_v46 }
 0x2f3   : > { %v1511_v53 = vpop.f32.mrb[23].mxu0 }
 0x2f4   : > { %v1037_v54 = vadd.f32 %v1509_v50, %v2191_v37  ;;  %v1512_v55 = vadd.f32 %v1511_v53, %v1510_v51  ;;  %1601 = vmatprep.mubr.bf16.mxu0 %v1107_v52 }
 0x2f6   : > { %v1040_v56 = vadd.f32 %v1512_v55, %v2191_v37  ;;  %v1093_v57 = vmax.f32 %v1037_v54, 0.0 }
 0x2f8   : > { %v1094_v58 = vmax.f32 %v1040_v56, 0.0  ;;  %v1513_v59 = vpop.f32.mrb[24].mxu0 }
 0x2f9   : > { %v1514_v60 = vpop.f32.mrb[25].mxu0 }
 0x2fa   : > { %v1108_v61 = vpack.c.bf16 %v1094_v58, %v1093_v57  ;;  %v1515_v62 = vadd.f32 %v1514_v60, %v1513_v59  ;;  %v1516_v63 = vpop.f32.mrb[26].mxu0 }
 0x2fb   : > { %v1517_v0 = vpop.f32.mrb[27].mxu0 }
 0x2fc   : > { %v1045_v1 = vadd.f32 %v1515_v62, %v2191_v37  ;;  %v1518_v2 = vadd.f32 %v1517_v0, %v1516_v63  ;;  %1602 = vmatmul.mubr.bf16.vlgmr.msra.gmra.mrb[48].mxu0 %v1108_v61  ;;  %v1460_v63 = vld [vmem:[%s2293_s8] ss:$0 sm:$0xff] }
 0x2fe   : > { %v1048_v3 = vadd.f32 %v1518_v2, %v2191_v37  ;;  %v1095_v4 = vmax.f32 %v1045_v1, 0.0 }
 0x300   : > { %v1096_v5 = vmax.f32 %v1048_v3, 0.0  ;;  %v1519_v6 = vpop.f32.mrb[28].mxu0 }
 0x301   : > { %v1520_v7 = vpop.f32.mrb[29].mxu0 }
 0x302   : > { %v1521_v8 = vadd.f32 %v1520_v7, %v1519_v6  ;;  %v1522_v9 = vpop.f32.mrb[30].mxu0  ;;  %v1109_v10 = vpack.c.bf16 %v1096_v5, %v1095_v4 }
 0x303   : > { %v1523_v11 = vpop.f32.mrb[31].mxu0 }
 0x304   : > { %v1053_v12 = vadd.f32 %v1521_v8, %v2191_v37  ;;  %v1524_v13 = vadd.f32 %v1523_v11, %v1522_v9  ;;  %1605 = vmatprep.mubr.bf16.mxu1 %v1109_v10 }
 0x306   : > { %v1056_v14 = vadd.f32 %v1524_v13, %v2191_v37  ;;  %v1097_v15 = vmax.f32 %v1053_v12, 0.0 }
 0x308   : > { %v1098_v16 = vmax.f32 %v1056_v14, 0.0  ;;  %v1525_v17 = vpop.f32.mrb[32].mxu0 }
 0x309   : > { %v1526_v18 = vpop.f32.mrb[33].mxu0 }
 0x30a   : > { %v1110_v19 = vpack.c.bf16 %v1098_v16, %v1097_v15  ;;  %v1527_v20 = vadd.f32 %v1526_v18, %v1525_v17  ;;  %v1528_v21 = vpop.f32.mrb[34].mxu0 }
 0x30b   : > { %v1529_v22 = vpop.f32.mrb[35].mxu0 }
 0x30c   : > { %v1061_v23 = vadd.f32 %v1527_v20, %v2191_v37  ;;  %v1530_v24 = vadd.f32 %v1529_v22, %v1528_v21  ;;  %1606 = vmatmul.mubr.bf16.vlgmr.msra.gmra.mrb[32].mxu1 %v1110_v19 }
 0x30e   : > { %v1064_v25 = vadd.f32 %v1530_v24, %v2191_v37  ;;  %v1099_v27 = vmax.f32 %v1061_v23, 0.0 }
 0x310   : > { %v1100_v28 = vmax.f32 %v1064_v25, 0.0  ;;  %v1531_v29 = vpop.f32.mrb[36].mxu0 }
 0x311   : > { %v1532_v30 = vpop.f32.mrb[37].mxu0 }
 0x312   : > { %v1533_v31 = vadd.f32 %v1532_v30, %v1531_v29  ;;  %v1534_v32 = vpop.f32.mrb[38].mxu0  ;;  %v1111_v33 = vpack.c.bf16 %v1100_v28, %v1099_v27 }
 0x313   : > { %v1535_v34 = vpop.f32.mrb[39].mxu0 }
 0x314   : > { %v1069_v44 = vadd.f32 %v1533_v31, %v2191_v37  ;;  %v1536_v45 = vadd.f32 %v1535_v34, %v1534_v32  ;;  %1609 = vmatprep.mubr.bf16.mxu1 %v1111_v33 }
 0x316   : > { %v1072_v35 = vadd.f32 %v1536_v45, %v2191_v37  ;;  %v1101_v36 = vmax.f32 %v1069_v44, 0.0 }
 0x318   : > { %v1102_v38 = vmax.f32 %v1072_v35, 0.0  ;;  %v1537_v39 = vpop.f32.mrb[40].mxu0 }
 0x319   : > { %v1538_v26 = vpop.f32.mrb[41].mxu0 }
 0x31a   : > { %v1539_v40 = vadd.f32 %v1538_v26, %v1537_v39  ;;  %v1540_v41 = vpop.f32.mrb[42].mxu0  ;;  %v1112_v42 = vpack.c.bf16 %v1102_v38, %v1101_v36 }
 0x31b   : > { %v1541_v43 = vpop.f32.mrb[43].mxu0 }
 0x31c   : > { %v1077_v46 = vadd.f32 %v1539_v40, %v2191_v37  ;;  %v1542_v47 = vadd.f32 %v1541_v43, %v1540_v41  ;;  %1610 = vmatmul.mubr.bf16.gmra.mrb[36].mxu1 %v1112_v42 }
 0x31e   : > { %v1080_v48 = vadd.f32 %v1542_v47, %v2191_v37  ;;  %v1103_v49 = vmax.f32 %v1077_v46, 0.0 }
 0x320   : > { %v1104_v50 = vmax.f32 %v1080_v48, 0.0  ;;  %v1543_v51 = vpop.f32.mrb[44].mxu0 }
 0x321   : > { %v1544_v52 = vpop.f32.mrb[45].mxu0 }
 0x322   : > { %v1545_v53 = vadd.f32 %v1544_v52, %v1543_v51  ;;  %v1546_v54 = vpop.f32.mrb[46].mxu0  ;;  %v1113_v55 = vpack.c.bf16 %v1104_v50, %v1103_v49 }
 0x323   : > { %v1547_v56 = vpop.f32.mrb[47].mxu0 }
 0x324   : > { %v1085_v57 = vadd.f32 %v1545_v53, %v2191_v37  ;;  %v1548_v58 = vadd.f32 %v1547_v56, %v1546_v54  ;;  %1613 = vmatprep.mubr.bf16.mxu1 %v1113_v55 }
 0x326   : > { %v1088_v59 = vadd.f32 %v1548_v58, %v2191_v37  ;;  %v1105_v60 = vmax.f32 %v1085_v57, 0.0 }
 0x328   : > { %v1106_v61 = vmax.f32 %v1088_v59, 0.0 }
 0x32a   : > { %v1114_v62 = vpack.c.bf16 %v1106_v61, %v1105_v60 }
 0x32c   : > { %1614 = vmatmul.mubr.bf16.gmra.mrb[40].mxu1 %v1114_v62 }
 0x3cf   : > { %v1603_v0 = vpop.f32.mrb[48].mxu0 }
 0x3d0   : > { %v1229_v1 = vadd.f32 %v1603_v0, %v1460_v63  ;;  %v1220_v2 = vpop.f32.mrb[49].mxu0 }
 0x3d1   : > { %v1221_v3 = vadd.f32 %v1460_v63, %v1220_v2  ;;  %v1604_v4 = vpop.f32.mrb[50].mxu0 }
 0x3d2   : > { %1285 = vst [vmem:[%s2215_s16 + $0x10] sm:$0xff] %v1229_v1  ;;  %v1232_v37 = vadd.f32 %v1604_v4, %v1460_v63  ;;  %v1223_v5 = vpop.f32.mrb[51].mxu0 }
 0x3d3   : > { %1283 = vst [vmem:[%s2215_s16] sm:$0xff] %v1221_v3  ;;  %v1224_v6 = vadd.f32 %v1460_v63, %v1223_v5 }
 0x3d4   : > { %1286 = vst [vmem:[%s2215_s16 + $0x18] sm:$0xff] %v1232_v37 }
 0x3d5   : > { %1284 = vst [vmem:[%s2215_s16 + $0x8] sm:$0xff] %v1224_v6 }
 0x3df   : > { %v1607_v7 = vpop.f32.mrb[32].mxu1 }
 0x3e0   : > { %v1245_v8 = vadd.f32 %v1607_v7, %v1460_v63  ;;  %v1236_v9 = vpop.f32.mrb[33].mxu1 }
 0x3e1   : > { %v1237_v10 = vadd.f32 %v1460_v63, %v1236_v9  ;;  %v1608_v11 = vpop.f32.mrb[34].mxu1 }
 0x3e2   : > { %1289 = vst [vmem:[%s2215_s16 + $0x30] sm:$0xff] %v1245_v8  ;;  %v1248_v12 = vadd.f32 %v1608_v11, %v1460_v63  ;;  %v1239_v13 = vpop.f32.mrb[35].mxu1 }
 0x3e3   : > { %1287 = vst [vmem:[%s2215_s16 + $0x20] sm:$0xff] %v1237_v10  ;;  %v1240_v14 = vadd.f32 %v1460_v63, %v1239_v13 }
 0x3e4   : > { %1290 = vst [vmem:[%s2215_s16 + $0x38] sm:$0xff] %v1248_v12 }
 0x3e5   : > { %1288 = vst [vmem:[%s2215_s16 + $0x28] sm:$0xff] %v1240_v14 }
 0x3ef   : > { %v1611_v15 = vpop.f32.mrb[36].mxu1 }
 0x3f0   : > { %v1261_v16 = vadd.f32 %v1611_v15, %v1460_v63  ;;  %v1252_v17 = vpop.f32.mrb[37].mxu1 }
 0x3f1   : > { %v1253_v18 = vadd.f32 %v1460_v63, %v1252_v17  ;;  %v1612_v19 = vpop.f32.mrb[38].mxu1 }
 0x3f2   : > { %1293 = vst [vmem:[%s2215_s16 + $0x50] sm:$0xff] %v1261_v16  ;;  %v1264_v20 = vadd.f32 %v1612_v19, %v1460_v63  ;;  %v1255_v21 = vpop.f32.mrb[39].mxu1 }
 0x3f3   : > { %1291 = vst [vmem:[%s2215_s16 + $0x40] sm:$0xff] %v1253_v18  ;;  %v1256_v22 = vadd.f32 %v1460_v63, %v1255_v21 }
 0x3f4   : > { %1294 = vst [vmem:[%s2215_s16 + $0x58] sm:$0xff] %v1264_v20 }
 0x3f5   : > { %1292 = vst [vmem:[%s2215_s16 + $0x48] sm:$0xff] %v1256_v22 }
 0x3ff   : > { %v1615_v23 = vpop.f32.mrb[40].mxu1 }
 0x400   : > { %v1277_v24 = vadd.f32 %v1615_v23, %v1460_v63  ;;  %v1268_v25 = vpop.f32.mrb[41].mxu1 }
 0x401   : > { %v1269_v27 = vadd.f32 %v1460_v63, %v1268_v25  ;;  %v1616_v28 = vpop.f32.mrb[42].mxu1 }
 0x402   : > { %1297 = vst [vmem:[%s2215_s16 + $0x70] sm:$0xff] %v1277_v24  ;;  %v1280_v29 = vadd.f32 %v1616_v28, %v1460_v63  ;;  %v1271_v30 = vpop.f32.mrb[43].mxu1 }
 0x403   : > { %1295 = vst [vmem:[%s2215_s16 + $0x60] sm:$0xff] %v1269_v27  ;;  %v1272_v31 = vadd.f32 %v1460_v63, %v1271_v30 }
 0x404   : > { %1298 = vst [vmem:[%s2215_s16 + $0x78] sm:$0xff] %v1280_v29 }
 0x405   : > { %1296 = vst [vmem:[%s2215_s16 + $0x68] sm:$0xff] %v1272_v31 }
 0x406   : > { %1825 = shalt.err (!%p1822_p11)
}
 0x407   : > { %s1826_s26 = scalar_lea.hbm %s2235_s23, 2048  ;;  %s1830_s29 = scalar_lea.hbm %s2294_s9, 4096 }
 0x408   : > { %p1827_p13 = scmp.ne.s32.totalorder %s2235_s23, %s1826_s26  ;;  %p1831_p6 = scmp.lt.u32.totalorder %s2235_s23, %s2294_s9 }
 0x409   : > { %p1832_p9 = scmp.lt.u32.totalorder %s1830_s29, %s1826_s26  ;;  %p1834_p12 = scmp.lt.u32.totalorder %s1826_s26, %s2235_s23 }
 0x40a   : > { %p1828_p5 = pnand %p1827_p13, %p2313_p1 }
 0x40b   : > { %p1833_p10 = por %p1832_p9, %p1831_p6 }
 0x40c   : > { %p1829_p0 = pneg %p1828_p5 }
 0x40d   : > { %p1835_p2 = por %p1834_p12, %p1833_p10 }
 0x40f   : > { %p1836_p3 = pnand %p1835_p2, %p1829_p0 }
 0x411   : > { %1839 = shalt.err (!%p1836_p3)
}
 0x412   : > { %s1890_s17 = smov 128   ;;  %s1891_s27 = smov 8  }
 0x413   : > { %1641 = dma.vmem_to_hbm [thread:$0]  (%p2313_p1), %s2237_s22, 2048, %s2235_s23, %s2244_s13, %s1890_s17, %s1890_s17, %s1891_s27  }
 0x414 PF: > { %p1658_p4 = scmp.ge.s32.totalorder %s1882_s12, 2  ;;  %s1328_s25 = sand.u32 1, %s1870_s30  }
 0x415   : > { %p2314_p7 = scmp.ne.s32.totalorder %s2305_s20, 0  ;;  %s1329_s11 = scalar_lea.sflag [#allocation4], %s1328_s25 }
 0x417   : > { %p1651_p8 = pnand %p1658_p4, %p2314_p7 }
 0x419   : > { %1865 = dma.done.wait (!%p1651_p8), %s1329_s11, 2048  }
 0x41a   : > { %1867 = vsyncadd (!%p1651_p8), %s1329_s11, 4294965248  ;;  %s2315_s12 = sld [smem:[#allocation12_spill]]  ;;  %s2316_s15 = sld [smem:[#allocation11_spill]] }
 0x41b   : > { %s2317_s11 = sld [smem:[#allocation13_spill]]  ;;  %s2318_s30 = smov %s1874_s10 }
 0x420   : > { %p21_p11 = scmp.ge.s32.totalorder %s2315_s12, 4   ;;  %s2319_s10 = smov %s2316_s15 }
 0x422   :  { %23 = sbr.rel (!%p21_p11) target bundleno = 5 (0x5), region = 100 }
 0x429   :  { %1334 = vsyncpa [#allocation3], 1 }
 0x42a   :  { %1336 = vsyncpa [#allocation3 + $0x1], 1 }
 0x42b   :  { %1337 = vsyncpa [#allocation6], 1 }
 0x42c   :  { %1338 = vsyncpa [#allocation4], 1 }
 0x42d   :  { %1340 = vsyncpa [#allocation4 + $0x1], 1 }

</bundles_post_ra>
